<compile_context>
chip_gen: v5e
topology: v5e:2x2
jax: 0.10.0
libtpu: 0.0.40
codegen_flags: <defaults>
</compile_context>

<pallas_src>
import functools

import jax
import jax.numpy as jnp
from jax import lax
from jax.experimental import pallas as pl
from jax.experimental.pallas import tpu as pltpu


def _bvqi_kernel(vis_ref, diff_ref, sa_ref, *, t_blk, n_frames, inv_m):
    # One grid step = (batch b, frame-block tb) of t_blk frames x P tokens.
    #   vis_ref:  (t_blk, P, D)   frames [tb*t_blk, tb*t_blk + t_blk) incl. CLS
    #   diff_ref: (n_pairs, D)    pre-differenced text features (grid-invariant)
    #   sa_ref:   (n_pairs, 1)    output block for batch b; accumulator across tb
    tb = pl.program_id(1)

    @pl.when(tb == 0)
    def _init():
        sa_ref[...] = jnp.zeros_like(sa_ref)

    diff = diff_ref[...]                                      # (n_pairs, D)
    n_pairs = diff.shape[0]

    def frame_contrib(t, acc):
        frame = vis_ref[t]                                    # (P, D)
        # d[k, p] = (text_2k - text_{2k+1}) . vis[p]   -- lane-dense (n_pairs, P)
        d = lax.dot_general(diff, frame, (((1,), (1,)), ((), ())),
                            preferred_element_type=jnp.float32)
        s = jnp.sum(jax.nn.sigmoid(2.0 * d), axis=-1, keepdims=True)  # (n_pairs, 1)
        g = tb * t_blk + t
        # Mask the CLS frame (g == 0) and any tail padding (g >= n_frames).
        valid = jnp.logical_and(g >= 1, g < n_frames)
        return acc + jnp.where(valid, s, 0.0)

    acc = lax.fori_loop(0, t_blk, frame_contrib,
                        jnp.zeros((n_pairs, 1), jnp.float32), unroll=True)
    sa_ref[...] += acc                                        # one RMW per step

    @pl.when(tb == pl.num_programs(1) - 1)
    def _finalize():
        sa_ref[...] *= inv_m                                  # sum -> mean


def bvqi_forward(vis_feat, sn_ind, tn_ind, text_feats, final_w, *, n_pairs=2,
                 vis_tile_budget_bytes=24 << 20):
    """Returns (final_feats (B, n_pairs+2), final_ln(final_feats).flatten() (B,))."""
    B, T1, P, D = vis_feat.shape          # T1 = T + 1 (CLS / temporal token incl.)
    T = T1 - 1
    F = n_pairs + 2

    # sigmoid(2 x.t_{2k} - 2 x.t_{2k+1}) == sigmoid(2 x.(t_{2k} - t_{2k+1})):
    # pre-difference the text features (tiny (N, D) op outside the kernel).
    tf = text_feats[: 2 * n_pairs].astype(jnp.float32)
    diff = (tf[0::2] - tf[1::2]).astype(vis_feat.dtype)       # (n_pairs, D)

    # Frames per grid step, sized so the double-buffered vis tile stays within
    # the budget (v7x 64 MiB VMEM is the binding generation).
    itemsize = jnp.dtype(vis_feat.dtype).itemsize
    per_frame = P * D * itemsize
    t_blk = int(max(1, min(T1, vis_tile_budget_bytes // (2 * per_frame))))
    n_tb = pl.cdiv(T1, t_blk)

    cost = pl.CostEstimate(
        flops=2 * B * T1 * P * D * n_pairs,
        transcendentals=B * T1 * P * n_pairs,
        bytes_accessed=int(B * T1 * P * D * itemsize
                           + n_pairs * D * itemsize + B * n_pairs * 4),
    )

    kernel = functools.partial(_bvqi_kernel, t_blk=t_blk, n_frames=T1,
                               inv_m=1.0 / float(T * P))
    sa = pl.pallas_call(
        kernel,
        out_shape=jax.ShapeDtypeStruct((B, n_pairs, 1), jnp.float32),
        grid=(B, n_tb),
        in_specs=[
            pl.BlockSpec((None, t_blk, P, D), lambda b, tb: (b, tb, 0, 0)),
            pl.BlockSpec((n_pairs, D), lambda b, tb: (0, 0)),
        ],
        out_specs=pl.BlockSpec((None, n_pairs, 1), lambda b, tb: (b, 0, 0)),
        compiler_params=pltpu.CompilerParams(
            dimension_semantics=("parallel", "arbitrary"),
            vmem_limit_bytes=40 << 20),
        cost_estimate=cost,
    )(vis_feat, diff)

    # Tiny epilogue in the wrapper: [sn, tn, sa_0..sa_{n_pairs-1}] and final_ln.
    sa = sa.reshape(B, n_pairs)
    feats = jnp.concatenate(
        [sn_ind.reshape(B, 1).astype(jnp.float32),
         tn_ind.reshape(B, 1).astype(jnp.float32), sa], axis=-1)     # (B, F)
    out = (feats @ final_w.astype(jnp.float32).reshape(1, F).T).reshape(-1)
    return feats, out


def _reference(vis_feat, sn_ind, tn_ind, text_feats, final_w, *, n_pairs=2):
    """Pure-JAX reference mirroring the PyTorch forward (eval mode)."""
    vis_feats = vis_feat[:, 1:].astype(jnp.float32)
    logits = 2.0 * jnp.einsum("btpd,nd->btpn", vis_feats,
                              text_feats.astype(jnp.float32))
    sa = []
    for k in range(n_pairs):
        pn = logits[..., 2 * k:2 * k + 2]
        sa.append(jax.nn.sigmoid(pn[..., 0] - pn[..., 1]).mean((-1, -2)))
    feats = jnp.stack([sn_ind, tn_ind] + sa, axis=-1).astype(jnp.float32)
    out = (feats @ final_w.T).reshape(-1)
    return feats, out


if __name__ == "__main__":
    B, T, P, D = 2, 8, 8, 32          # vis_feat: (B, T+1, P, D)
    n_pairs = 2
    N = 2 * n_pairs                   # number of text prompts actually used
    F = n_pairs + 2

    key = jax.random.PRNGKey(0)
    k_vis, k_text, k_sn, k_tn = jax.random.split(key, 4)
    vis_feat = jax.random.normal(k_vis, (B, T + 1, P, D), dtype=jnp.float32)
    text_feats = jax.random.normal(k_text, (N, D), dtype=jnp.float32)
    sn_ind = jax.random.uniform(k_sn, (B,), dtype=jnp.float32)
    tn_ind = jax.random.uniform(k_tn, (B,), dtype=jnp.float32)
    # torch.nn.init.constant_(self.final_ln.weight, 1)
    final_w = jnp.ones((1, F), dtype=jnp.float32)

    feats, out = bvqi_forward(vis_feat, sn_ind, tn_ind, text_feats, final_w,
                              n_pairs=n_pairs)
    jax.block_until_ready((feats, out))

    ref_feats, ref_out = _reference(vis_feat, sn_ind, tn_ind, text_feats,
                                    final_w, n_pairs=n_pairs)
    assert feats.shape == (B, F) and out.shape == (B,)
    assert jnp.allclose(feats, ref_feats, atol=1e-5, rtol=1e-5)
    assert jnp.allclose(out, ref_out, atol=1e-5, rtol=1e-5)

    print("KERNEL_OK")
</pallas_src>

<mosaic_0001>
module attributes {stable_mosaic.version = 11 : i64} {
  func.func @_bvqi_kernel(%arg0: i32, %arg1: i32, %arg2: memref<1x9x8x32xf32, #tpu.memory_space<vmem>>, %arg3: memref<2x32xf32, #tpu.memory_space<vmem>>, %arg4: memref<1x2x1xf32, #tpu.memory_space<vmem>>) attributes {dimension_semantics = [#tpu.dimension_semantics<parallel>, #tpu.dimension_semantics<arbitrary>], iteration_bounds = array<i64: 2, 1>, scalar_prefetch = 0 : i64, scratch_operands = 0 : i64, tpu.core_type = #tpu.core_type<tc>, window_params = [{transform_indices = @transform_0, window_bounds = array<i64: 1, 9, 8, 32>}, {pipeline_mode = #tpu.pipeline_mode<synchronous>, transform_indices = @transform_1, window_bounds = array<i64: 2, 32>}, {transform_indices = @transform_2, window_bounds = array<i64: 1, 2, 1>}]} {
    %c0_i32 = arith.constant 0 : i32
    %0 = arith.cmpi eq, %arg1, %c0_i32 : i32
    %1 = arith.extui %0 : i1 to i32
    %c0_i32_0 = arith.constant 0 : i32
    %2 = arith.cmpi ne, %1, %c0_i32_0 : i32
    scf.if %2 {
      %cst_110 = arith.constant 0.000000e+00 : f32
      %203 = vector.broadcast %cst_110 : f32 to vector<2x1xf32>
      %c0_111 = arith.constant 0 : index
      %c0_112 = arith.constant 0 : index
      %c0_113 = arith.constant 0 : index
      %204 = vector.load %arg4[%c0_111, %c0_112, %c0_113] : memref<1x2x1xf32, #tpu.memory_space<vmem>>, vector<1x2x1xf32>
      %205 = vector.shape_cast %204 : vector<1x2x1xf32> to vector<2x1xf32>
      %206 = vector.shape_cast %203 : vector<2x1xf32> to vector<1x2x1xf32>
      tpu.vector_store %arg4[%c0_111, %c0_112, %c0_113], %206 {strides = array<i32>} : memref<1x2x1xf32, #tpu.memory_space<vmem>>, vector<1x2x1xf32>,
    } else {
    }
    %c0 = arith.constant 0 : index
    %c0_1 = arith.constant 0 : index
    %3 = vector.load %arg3[%c0, %c0_1] : memref<2x32xf32, #tpu.memory_space<vmem>>, vector<2x32xf32>
    %cst = arith.constant 0.000000e+00 : f32
    %4 = vector.broadcast %cst : f32 to vector<2x1xf32>
    %c0_i32_2 = arith.constant 0 : i32
    %c0_3 = arith.constant 0 : index
    %5 = arith.index_cast %c0_i32_2 : i32 to index
    %c0_4 = arith.constant 0 : index
    %c0_5 = arith.constant 0 : index
    %6 = vector.load %arg2[%c0_3, %5, %c0_4, %c0_5] : memref<1x9x8x32xf32, #tpu.memory_space<vmem>>, vector<1x1x8x32xf32>
    %7 = vector.shape_cast %6 : vector<1x1x8x32xf32> to vector<8x32xf32>
    %cst_6 = arith.constant dense<0.000000e+00> : vector<2x8xf32>
    %8 = tpu.matmul %3, %7, %cst_6 {dimension_numbers = #tpu.dot_dimension_numbers<[1], [1], [0], [0], [0, 0, 1, 0], [], []>} : vector<2x32xf32>, vector<8x32xf32>, vector<2x8xf32> -> vector<2x8xf32>
    %cst_7 = arith.constant 2.000000e+00 : f32
    %9 = vector.broadcast %cst_7 : f32 to vector<2x8xf32>
    %10 = arith.mulf %9, %8 : vector<2x8xf32>
    %11 = arith.negf %10 : vector<2x8xf32>
    %12 = math.exp %11 : vector<2x8xf32>
    %cst_8 = arith.constant 1.000000e+00 : f32
    %13 = vector.broadcast %cst_8 : f32 to vector<2x8xf32>
    %14 = arith.addf %13, %12 : vector<2x8xf32>
    %15 = arith.divf %13, %14 : vector<2x8xf32>
    %cst_9 = arith.constant dense<0.000000e+00> : vector<2xf32>
    %16 = vector.multi_reduction <add>, %15, %cst_9 [1] : vector<2x8xf32> to vector<2xf32>
    %17 = vector.shape_cast %16 : vector<2xf32> to vector<2x1xf32>
    %c9_i32 = arith.constant 9 : i32
    %18 = arith.muli %arg1, %c9_i32 : i32
    %19 = arith.addi %18, %c0_i32_2 : i32
    %c1_i32 = arith.constant 1 : i32
    %20 = arith.cmpi sge, %19, %c1_i32 : i32
    %c9_i32_10 = arith.constant 9 : i32
    %21 = arith.cmpi slt, %19, %c9_i32_10 : i32
    %22 = arith.andi %20, %21 : i1
    %cst_11 = arith.constant 0.000000e+00 : f32
    %23 = vector.broadcast %cst_11 : f32 to vector<2x1xf32>
    %24 = arith.select %22, %17, %23 : vector<2x1xf32>
    %25 = arith.addf %4, %24 : vector<2x1xf32>
    %c1_i32_12 = arith.constant 1 : i32
    %c0_13 = arith.constant 0 : index
    %26 = arith.index_cast %c1_i32_12 : i32 to index
    %c0_14 = arith.constant 0 : index
    %c0_15 = arith.constant 0 : index
    %27 = vector.load %arg2[%c0_13, %26, %c0_14, %c0_15] : memref<1x9x8x32xf32, #tpu.memory_space<vmem>>, vector<1x1x8x32xf32>
    %28 = vector.shape_cast %27 : vector<1x1x8x32xf32> to vector<8x32xf32>
    %cst_16 = arith.constant dense<0.000000e+00> : vector<2x8xf32>
    %29 = tpu.matmul %3, %28, %cst_16 {dimension_numbers = #tpu.dot_dimension_numbers<[1], [1], [0], [0], [0, 0, 1, 0], [], []>} : vector<2x32xf32>, vector<8x32xf32>, vector<2x8xf32> -> vector<2x8xf32>
    %cst_17 = arith.constant 2.000000e+00 : f32
    %30 = vector.broadcast %cst_17 : f32 to vector<2x8xf32>
    %31 = arith.mulf %30, %29 : vector<2x8xf32>
    %32 = arith.negf %31 : vector<2x8xf32>
    %33 = math.exp %32 : vector<2x8xf32>
    %cst_18 = arith.constant 1.000000e+00 : f32
    %34 = vector.broadcast %cst_18 : f32 to vector<2x8xf32>
    %35 = arith.addf %34, %33 : vector<2x8xf32>
    %36 = arith.divf %34, %35 : vector<2x8xf32>
    %cst_19 = arith.constant dense<0.000000e+00> : vector<2xf32>
    %37 = vector.multi_reduction <add>, %36, %cst_19 [1] : vector<2x8xf32> to vector<2xf32>
    %38 = vector.shape_cast %37 : vector<2xf32> to vector<2x1xf32>
    %c9_i32_20 = arith.constant 9 : i32
    %39 = arith.muli %arg1, %c9_i32_20 : i32
    %40 = arith.addi %39, %c1_i32_12 : i32
    %c1_i32_21 = arith.constant 1 : i32
    %41 = arith.cmpi sge, %40, %c1_i32_21 : i32
    %c9_i32_22 = arith.constant 9 : i32
    %42 = arith.cmpi slt, %40, %c9_i32_22 : i32
    %43 = arith.andi %41, %42 : i1
    %cst_23 = arith.constant 0.000000e+00 : f32
    %44 = vector.broadcast %cst_23 : f32 to vector<2x1xf32>
    %45 = arith.select %43, %38, %44 : vector<2x1xf32>
    %46 = arith.addf %25, %45 : vector<2x1xf32>
    %c2_i32 = arith.constant 2 : i32
    %c0_24 = arith.constant 0 : index
    %47 = arith.index_cast %c2_i32 : i32 to index
    %c0_25 = arith.constant 0 : index
    %c0_26 = arith.constant 0 : index
    %48 = vector.load %arg2[%c0_24, %47, %c0_25, %c0_26] : memref<1x9x8x32xf32, #tpu.memory_space<vmem>>, vector<1x1x8x32xf32>
    %49 = vector.shape_cast %48 : vector<1x1x8x32xf32> to vector<8x32xf32>
    %cst_27 = arith.constant dense<0.000000e+00> : vector<2x8xf32>
    %50 = tpu.matmul %3, %49, %cst_27 {dimension_numbers = #tpu.dot_dimension_numbers<[1], [1], [0], [0], [0, 0, 1, 0], [], []>} : vector<2x32xf32>, vector<8x32xf32>, vector<2x8xf32> -> vector<2x8xf32>
    %cst_28 = arith.constant 2.000000e+00 : f32
    %51 = vector.broadcast %cst_28 : f32 to vector<2x8xf32>
    %52 = arith.mulf %51, %50 : vector<2x8xf32>
    %53 = arith.negf %52 : vector<2x8xf32>
    %54 = math.exp %53 : vector<2x8xf32>
    %cst_29 = arith.constant 1.000000e+00 : f32
    %55 = vector.broadcast %cst_29 : f32 to vector<2x8xf32>
    %56 = arith.addf %55, %54 : vector<2x8xf32>
    %57 = arith.divf %55, %56 : vector<2x8xf32>
    %cst_30 = arith.constant dense<0.000000e+00> : vector<2xf32>
    %58 = vector.multi_reduction <add>, %57, %cst_30 [1] : vector<2x8xf32> to vector<2xf32>
    %59 = vector.shape_cast %58 : vector<2xf32> to vector<2x1xf32>
    %c9_i32_31 = arith.constant 9 : i32
    %60 = arith.muli %arg1, %c9_i32_31 : i32
    %61 = arith.addi %60, %c2_i32 : i32
    %c1_i32_32 = arith.constant 1 : i32
    %62 = arith.cmpi sge, %61, %c1_i32_32 : i32
    %c9_i32_33 = arith.constant 9 : i32
    %63 = arith.cmpi slt, %61, %c9_i32_33 : i32
    %64 = arith.andi %62, %63 : i1
    %cst_34 = arith.constant 0.000000e+00 : f32
    %65 = vector.broadcast %cst_34 : f32 to vector<2x1xf32>
    %66 = arith.select %64, %59, %65 : vector<2x1xf32>
    %67 = arith.addf %46, %66 : vector<2x1xf32>
    %c3_i32 = arith.constant 3 : i32
    %c0_35 = arith.constant 0 : index
    %68 = arith.index_cast %c3_i32 : i32 to index
    %c0_36 = arith.constant 0 : index
    %c0_37 = arith.constant 0 : index
    %69 = vector.load %arg2[%c0_35, %68, %c0_36, %c0_37] : memref<1x9x8x32xf32, #tpu.memory_space<vmem>>, vector<1x1x8x32xf32>
    %70 = vector.shape_cast %69 : vector<1x1x8x32xf32> to vector<8x32xf32>
    %cst_38 = arith.constant dense<0.000000e+00> : vector<2x8xf32>
    %71 = tpu.matmul %3, %70, %cst_38 {dimension_numbers = #tpu.dot_dimension_numbers<[1], [1], [0], [0], [0, 0, 1, 0], [], []>} : vector<2x32xf32>, vector<8x32xf32>, vector<2x8xf32> -> vector<2x8xf32>
    %cst_39 = arith.constant 2.000000e+00 : f32
    %72 = vector.broadcast %cst_39 : f32 to vector<2x8xf32>
    %73 = arith.mulf %72, %71 : vector<2x8xf32>
    %74 = arith.negf %73 : vector<2x8xf32>
    %75 = math.exp %74 : vector<2x8xf32>
    %cst_40 = arith.constant 1.000000e+00 : f32
    %76 = vector.broadcast %cst_40 : f32 to vector<2x8xf32>
    %77 = arith.addf %76, %75 : vector<2x8xf32>
    %78 = arith.divf %76, %77 : vector<2x8xf32>
    %cst_41 = arith.constant dense<0.000000e+00> : vector<2xf32>
    %79 = vector.multi_reduction <add>, %78, %cst_41 [1] : vector<2x8xf32> to vector<2xf32>
    %80 = vector.shape_cast %79 : vector<2xf32> to vector<2x1xf32>
    %c9_i32_42 = arith.constant 9 : i32
    %81 = arith.muli %arg1, %c9_i32_42 : i32
    %82 = arith.addi %81, %c3_i32 : i32
    %c1_i32_43 = arith.constant 1 : i32
    %83 = arith.cmpi sge, %82, %c1_i32_43 : i32
    %c9_i32_44 = arith.constant 9 : i32
    %84 = arith.cmpi slt, %82, %c9_i32_44 : i32
    %85 = arith.andi %83, %84 : i1
    %cst_45 = arith.constant 0.000000e+00 : f32
    %86 = vector.broadcast %cst_45 : f32 to vector<2x1xf32>
    %87 = arith.select %85, %80, %86 : vector<2x1xf32>
    %88 = arith.addf %67, %87 : vector<2x1xf32>
    %c4_i32 = arith.constant 4 : i32
    %c0_46 = arith.constant 0 : index
    %89 = arith.index_cast %c4_i32 : i32 to index
    %c0_47 = arith.constant 0 : index
    %c0_48 = arith.constant 0 : index
    %90 = vector.load %arg2[%c0_46, %89, %c0_47, %c0_48] : memref<1x9x8x32xf32, #tpu.memory_space<vmem>>, vector<1x1x8x32xf32>
    %91 = vector.shape_cast %90 : vector<1x1x8x32xf32> to vector<8x32xf32>
    %cst_49 = arith.constant dense<0.000000e+00> : vector<2x8xf32>
    %92 = tpu.matmul %3, %91, %cst_49 {dimension_numbers = #tpu.dot_dimension_numbers<[1], [1], [0], [0], [0, 0, 1, 0], [], []>} : vector<2x32xf32>, vector<8x32xf32>, vector<2x8xf32> -> vector<2x8xf32>
    %cst_50 = arith.constant 2.000000e+00 : f32
    %93 = vector.broadcast %cst_50 : f32 to vector<2x8xf32>
    %94 = arith.mulf %93, %92 : vector<2x8xf32>
    %95 = arith.negf %94 : vector<2x8xf32>
    %96 = math.exp %95 : vector<2x8xf32>
    %cst_51 = arith.constant 1.000000e+00 : f32
    %97 = vector.broadcast %cst_51 : f32 to vector<2x8xf32>
    %98 = arith.addf %97, %96 : vector<2x8xf32>
    %99 = arith.divf %97, %98 : vector<2x8xf32>
    %cst_52 = arith.constant dense<0.000000e+00> : vector<2xf32>
    %100 = vector.multi_reduction <add>, %99, %cst_52 [1] : vector<2x8xf32> to vector<2xf32>
    %101 = vector.shape_cast %100 : vector<2xf32> to vector<2x1xf32>
    %c9_i32_53 = arith.constant 9 : i32
    %102 = arith.muli %arg1, %c9_i32_53 : i32
    %103 = arith.addi %102, %c4_i32 : i32
    %c1_i32_54 = arith.constant 1 : i32
    %104 = arith.cmpi sge, %103, %c1_i32_54 : i32
    %c9_i32_55 = arith.constant 9 : i32
    %105 = arith.cmpi slt, %103, %c9_i32_55 : i32
    %106 = arith.andi %104, %105 : i1
    %cst_56 = arith.constant 0.000000e+00 : f32
    %107 = vector.broadcast %cst_56 : f32 to vector<2x1xf32>
    %108 = arith.select %106, %101, %107 : vector<2x1xf32>
    %109 = arith.addf %88, %108 : vector<2x1xf32>
    %c5_i32 = arith.constant 5 : i32
    %c0_57 = arith.constant 0 : index
    %110 = arith.index_cast %c5_i32 : i32 to index
    %c0_58 = arith.constant 0 : index
    %c0_59 = arith.constant 0 : index
    %111 = vector.load %arg2[%c0_57, %110, %c0_58, %c0_59] : memref<1x9x8x32xf32, #tpu.memory_space<vmem>>, vector<1x1x8x32xf32>
    %112 = vector.shape_cast %111 : vector<1x1x8x32xf32> to vector<8x32xf32>
    %cst_60 = arith.constant dense<0.000000e+00> : vector<2x8xf32>
    %113 = tpu.matmul %3, %112, %cst_60 {dimension_numbers = #tpu.dot_dimension_numbers<[1], [1], [0], [0], [0, 0, 1, 0], [], []>} : vector<2x32xf32>, vector<8x32xf32>, vector<2x8xf32> -> vector<2x8xf32>
    %cst_61 = arith.constant 2.000000e+00 : f32
    %114 = vector.broadcast %cst_61 : f32 to vector<2x8xf32>
    %115 = arith.mulf %114, %113 : vector<2x8xf32>
    %116 = arith.negf %115 : vector<2x8xf32>
    %117 = math.exp %116 : vector<2x8xf32>
    %cst_62 = arith.constant 1.000000e+00 : f32
    %118 = vector.broadcast %cst_62 : f32 to vector<2x8xf32>
    %119 = arith.addf %118, %117 : vector<2x8xf32>
    %120 = arith.divf %118, %119 : vector<2x8xf32>
    %cst_63 = arith.constant dense<0.000000e+00> : vector<2xf32>
    %121 = vector.multi_reduction <add>, %120, %cst_63 [1] : vector<2x8xf32> to vector<2xf32>
    %122 = vector.shape_cast %121 : vector<2xf32> to vector<2x1xf32>
    %c9_i32_64 = arith.constant 9 : i32
    %123 = arith.muli %arg1, %c9_i32_64 : i32
    %124 = arith.addi %123, %c5_i32 : i32
    %c1_i32_65 = arith.constant 1 : i32
    %125 = arith.cmpi sge, %124, %c1_i32_65 : i32
    %c9_i32_66 = arith.constant 9 : i32
    %126 = arith.cmpi slt, %124, %c9_i32_66 : i32
    %127 = arith.andi %125, %126 : i1
    %cst_67 = arith.constant 0.000000e+00 : f32
    %128 = vector.broadcast %cst_67 : f32 to vector<2x1xf32>
    %129 = arith.select %127, %122, %128 : vector<2x1xf32>
    %130 = arith.addf %109, %129 : vector<2x1xf32>
    %c6_i32 = arith.constant 6 : i32
    %c0_68 = arith.constant 0 : index
    %131 = arith.index_cast %c6_i32 : i32 to index
    %c0_69 = arith.constant 0 : index
    %c0_70 = arith.constant 0 : index
    %132 = vector.load %arg2[%c0_68, %131, %c0_69, %c0_70] : memref<1x9x8x32xf32, #tpu.memory_space<vmem>>, vector<1x1x8x32xf32>
    %133 = vector.shape_cast %132 : vector<1x1x8x32xf32> to vector<8x32xf32>
    %cst_71 = arith.constant dense<0.000000e+00> : vector<2x8xf32>
    %134 = tpu.matmul %3, %133, %cst_71 {dimension_numbers = #tpu.dot_dimension_numbers<[1], [1], [0], [0], [0, 0, 1, 0], [], []>} : vector<2x32xf32>, vector<8x32xf32>, vector<2x8xf32> -> vector<2x8xf32>
    %cst_72 = arith.constant 2.000000e+00 : f32
    %135 = vector.broadcast %cst_72 : f32 to vector<2x8xf32>
    %136 = arith.mulf %135, %134 : vector<2x8xf32>
    %137 = arith.negf %136 : vector<2x8xf32>
    %138 = math.exp %137 : vector<2x8xf32>
    %cst_73 = arith.constant 1.000000e+00 : f32
    %139 = vector.broadcast %cst_73 : f32 to vector<2x8xf32>
    %140 = arith.addf %139, %138 : vector<2x8xf32>
    %141 = arith.divf %139, %140 : vector<2x8xf32>
    %cst_74 = arith.constant dense<0.000000e+00> : vector<2xf32>
    %142 = vector.multi_reduction <add>, %141, %cst_74 [1] : vector<2x8xf32> to vector<2xf32>
    %143 = vector.shape_cast %142 : vector<2xf32> to vector<2x1xf32>
    %c9_i32_75 = arith.constant 9 : i32
    %144 = arith.muli %arg1, %c9_i32_75 : i32
    %145 = arith.addi %144, %c6_i32 : i32
    %c1_i32_76 = arith.constant 1 : i32
    %146 = arith.cmpi sge, %145, %c1_i32_76 : i32
    %c9_i32_77 = arith.constant 9 : i32
    %147 = arith.cmpi slt, %145, %c9_i32_77 : i32
    %148 = arith.andi %146, %147 : i1
    %cst_78 = arith.constant 0.000000e+00 : f32
    %149 = vector.broadcast %cst_78 : f32 to vector<2x1xf32>
    %150 = arith.select %148, %143, %149 : vector<2x1xf32>
    %151 = arith.addf %130, %150 : vector<2x1xf32>
    %c7_i32 = arith.constant 7 : i32
    %c0_79 = arith.constant 0 : index
    %152 = arith.index_cast %c7_i32 : i32 to index
    %c0_80 = arith.constant 0 : index
    %c0_81 = arith.constant 0 : index
    %153 = vector.load %arg2[%c0_79, %152, %c0_80, %c0_81] : memref<1x9x8x32xf32, #tpu.memory_space<vmem>>, vector<1x1x8x32xf32>
    %154 = vector.shape_cast %153 : vector<1x1x8x32xf32> to vector<8x32xf32>
    %cst_82 = arith.constant dense<0.000000e+00> : vector<2x8xf32>
    %155 = tpu.matmul %3, %154, %cst_82 {dimension_numbers = #tpu.dot_dimension_numbers<[1], [1], [0], [0], [0, 0, 1, 0], [], []>} : vector<2x32xf32>, vector<8x32xf32>, vector<2x8xf32> -> vector<2x8xf32>
    %cst_83 = arith.constant 2.000000e+00 : f32
    %156 = vector.broadcast %cst_83 : f32 to vector<2x8xf32>
    %157 = arith.mulf %156, %155 : vector<2x8xf32>
    %158 = arith.negf %157 : vector<2x8xf32>
    %159 = math.exp %158 : vector<2x8xf32>
    %cst_84 = arith.constant 1.000000e+00 : f32
    %160 = vector.broadcast %cst_84 : f32 to vector<2x8xf32>
    %161 = arith.addf %160, %159 : vector<2x8xf32>
    %162 = arith.divf %160, %161 : vector<2x8xf32>
    %cst_85 = arith.constant dense<0.000000e+00> : vector<2xf32>
    %163 = vector.multi_reduction <add>, %162, %cst_85 [1] : vector<2x8xf32> to vector<2xf32>
    %164 = vector.shape_cast %163 : vector<2xf32> to vector<2x1xf32>
    %c9_i32_86 = arith.constant 9 : i32
    %165 = arith.muli %arg1, %c9_i32_86 : i32
    %166 = arith.addi %165, %c7_i32 : i32
    %c1_i32_87 = arith.constant 1 : i32
    %167 = arith.cmpi sge, %166, %c1_i32_87 : i32
    %c9_i32_88 = arith.constant 9 : i32
    %168 = arith.cmpi slt, %166, %c9_i32_88 : i32
    %169 = arith.andi %167, %168 : i1
    %cst_89 = arith.constant 0.000000e+00 : f32
    %170 = vector.broadcast %cst_89 : f32 to vector<2x1xf32>
    %171 = arith.select %169, %164, %170 : vector<2x1xf32>
    %172 = arith.addf %151, %171 : vector<2x1xf32>
    %c8_i32 = arith.constant 8 : i32
    %c0_90 = arith.constant 0 : index
    %173 = arith.index_cast %c8_i32 : i32 to index
    %c0_91 = arith.constant 0 : index
    %c0_92 = arith.constant 0 : index
    %174 = vector.load %arg2[%c0_90, %173, %c0_91, %c0_92] : memref<1x9x8x32xf32, #tpu.memory_space<vmem>>, vector<1x1x8x32xf32>
    %175 = vector.shape_cast %174 : vector<1x1x8x32xf32> to vector<8x32xf32>
    %cst_93 = arith.constant dense<0.000000e+00> : vector<2x8xf32>
    %176 = tpu.matmul %3, %175, %cst_93 {dimension_numbers = #tpu.dot_dimension_numbers<[1], [1], [0], [0], [0, 0, 1, 0], [], []>} : vector<2x32xf32>, vector<8x32xf32>, vector<2x8xf32> -> vector<2x8xf32>
    %cst_94 = arith.constant 2.000000e+00 : f32
    %177 = vector.broadcast %cst_94 : f32 to vector<2x8xf32>
    %178 = arith.mulf %177, %176 : vector<2x8xf32>
    %179 = arith.negf %178 : vector<2x8xf32>
    %180 = math.exp %179 : vector<2x8xf32>
    %cst_95 = arith.constant 1.000000e+00 : f32
    %181 = vector.broadcast %cst_95 : f32 to vector<2x8xf32>
    %182 = arith.addf %181, %180 : vector<2x8xf32>
    %183 = arith.divf %181, %182 : vector<2x8xf32>
    %cst_96 = arith.constant dense<0.000000e+00> : vector<2xf32>
    %184 = vector.multi_reduction <add>, %183, %cst_96 [1] : vector<2x8xf32> to vector<2xf32>
    %185 = vector.shape_cast %184 : vector<2xf32> to vector<2x1xf32>
    %c9_i32_97 = arith.constant 9 : i32
    %186 = arith.muli %arg1, %c9_i32_97 : i32
    %187 = arith.addi %186, %c8_i32 : i32
    %c1_i32_98 = arith.constant 1 : i32
    %188 = arith.cmpi sge, %187, %c1_i32_98 : i32
    %c9_i32_99 = arith.constant 9 : i32
    %189 = arith.cmpi slt, %187, %c9_i32_99 : i32
    %190 = arith.andi %188, %189 : i1
    %cst_100 = arith.constant 0.000000e+00 : f32
    %191 = vector.broadcast %cst_100 : f32 to vector<2x1xf32>
    %192 = arith.select %190, %185, %191 : vector<2x1xf32>
    %193 = arith.addf %172, %192 : vector<2x1xf32>
    %c9_i32_101 = arith.constant 9 : i32
    %c0_102 = arith.constant 0 : index
    %c0_103 = arith.constant 0 : index
    %c0_104 = arith.constant 0 : index
    %194 = vector.load %arg4[%c0_102, %c0_103, %c0_104] : memref<1x2x1xf32, #tpu.memory_space<vmem>>, vector<1x2x1xf32>
    %195 = vector.shape_cast %194 : vector<1x2x1xf32> to vector<2x1xf32>
    %196 = arith.addf %195, %193 : vector<2x1xf32>
    %c0_105 = arith.constant 0 : index
    %c0_106 = arith.constant 0 : index
    %c0_107 = arith.constant 0 : index
    %197 = vector.load %arg4[%c0_105, %c0_106, %c0_107] : memref<1x2x1xf32, #tpu.memory_space<vmem>>, vector<1x2x1xf32>
    %198 = vector.shape_cast %197 : vector<1x2x1xf32> to vector<2x1xf32>
    %199 = vector.shape_cast %196 : vector<2x1xf32> to vector<1x2x1xf32>
    tpu.vector_store %arg4[%c0_105, %c0_106, %c0_107], %199 {strides = array<i32>} : memref<1x2x1xf32, #tpu.memory_space<vmem>>, vector<1x2x1xf32>,
    %c0_i32_108 = arith.constant 0 : i32
    %200 = arith.cmpi eq, %arg1, %c0_i32_108 : i32
    %201 = arith.extui %200 : i1 to i32
    %c0_i32_109 = arith.constant 0 : i32
    %202 = arith.cmpi ne, %201, %c0_i32_109 : i32
    scf.if %202 {
      %c0_110 = arith.constant 0 : index
      %c0_111 = arith.constant 0 : index
      %c0_112 = arith.constant 0 : index
      %203 = vector.load %arg4[%c0_110, %c0_111, %c0_112] : memref<1x2x1xf32, #tpu.memory_space<vmem>>, vector<1x2x1xf32>
      %204 = vector.shape_cast %203 : vector<1x2x1xf32> to vector<2x1xf32>
      %cst_113 = arith.constant 1.562500e-02 : f32
      %205 = vector.broadcast %cst_113 : f32 to vector<2x1xf32>
      %206 = arith.mulf %204, %205 : vector<2x1xf32>
      %c0_114 = arith.constant 0 : index
      %c0_115 = arith.constant 0 : index
      %c0_116 = arith.constant 0 : index
      %207 = vector.load %arg4[%c0_114, %c0_115, %c0_116] : memref<1x2x1xf32, #tpu.memory_space<vmem>>, vector<1x2x1xf32>
      %208 = vector.shape_cast %207 : vector<1x2x1xf32> to vector<2x1xf32>
      %209 = vector.shape_cast %206 : vector<2x1xf32> to vector<1x2x1xf32>
      tpu.vector_store %arg4[%c0_114, %c0_115, %c0_116], %209 {strides = array<i32>} : memref<1x2x1xf32, #tpu.memory_space<vmem>>, vector<1x2x1xf32>,
    } else {
    }
    return
  }
  func.func @transform_0(%arg0: i32, %arg1: i32) -> (i32, i32, i32, i32) {
    %c0_i32 = arith.constant 0 : i32
    %c0_i32_0 = arith.constant 0 : i32
    %c0_i32_1 = arith.constant 0 : i32
    return %arg0, %arg1, %c0_i32, %c0_i32_0 : i32, i32, i32, i32
  }
  func.func @transform_1(%arg0: i32, %arg1: i32) -> (i32, i32) {
    %c0_i32 = arith.constant 0 : i32
    %c0_i32_0 = arith.constant 0 : i32
    %c0_i32_1 = arith.constant 0 : i32
    return %c0_i32, %c0_i32_0 : i32, i32
  }
  func.func @transform_2(%arg0: i32, %arg1: i32) -> (i32, i32, i32) {
    %c0_i32 = arith.constant 0 : i32
    %c0_i32_0 = arith.constant 0 : i32
    %c0_i32_1 = arith.constant 0 : i32
    return %arg0, %c0_i32, %c0_i32_0 : i32, i32, i32
  }
}

</mosaic_0001>

<bundles_post_ra>
// kernel: tpu_custom_call.1
= control target key start
LH: loop header
LB: loop body
LE: loop exit
PB: predicated region body
PF: predicated region fallthrough
CT: control target
= control target key end

     0   :  { %7 = vsyncpa [#allocation3], 0  ;;  %s1365_s0 = inlined_call_operand.hbm [shape: f32[2,9,8,32], index: 0, kind: input, shape index: {}]   ;;  %s1366_s1 = inlined_call_operand.hbm [shape: f32[2,32], index: 1, kind: input, shape index: {}]   ;;  %s1367_s2 = inlined_call_operand.vmem [shape: f32[2,2,1], index: 2, kind: output, shape index: {}]  }
   0x1   :  { %9 = vsyncpa [#allocation3 + $0x1], 0 }
   0x2   :  { %10 = vsyncpa [#allocation5], 0  ;;  %s1110_s9 = smov 0   ;;  %s1112_s10 = smov 0  }
   0x3   :  { %s1114_s11 = smov 0   ;;  %s1116_s12 = smov 0  }
   0x4   :  { %s1118_s13 = smov 0   ;;  %s1120_s14 = smov 0  }
   0x5 LB: > { %s825_s15 = sadd.s32 4294967295, %s1089_s14   ;;  %s37_s16 = sadd.s32 1, %s1077_s11  ;;  %s1089_s14 = sphi %s1120_s14, %s16_s14   ;;  %s1085_s13 = sphi %s1118_s13, %s1389_s13   ;;  %s1081_s12 = sphi %s1116_s12, %s1388_s12   ;;  %s1077_s11 = sphi %s1114_s11, %s1387_s11   ;;  %s1073_s10 = sphi %s1112_s10, %s1386_s10   ;;  %s1069_s9 = sphi %s1110_s9, %s1385_s9  }
   0x6   : > { %p44_p0 = scmp.ne.s32.totalorder %s1077_s11, %s1073_s10  ;;  %p45_p1 = scmp.eq.s32.totalorder %s1089_s14, 0 }
   0x7   : > { %p50_p2 = scmp.ne.s32.totalorder %s1073_s10, %s1069_s9  ;;  %p1144_p3 = scmp.eq.s32.totalorder %s825_s15, 0 }
   0x8   : > { %p1148_p4 = por %p45_p1, %p44_p0  ;;  %p827_p5 = scmp.ge.s32.totalorder %s1089_s14, 1 }
   0x9   : > { %p1155_p6 = por %p1144_p3, %p50_p2  ;;  %p108_p7 = scmp.lt.s32.totalorder %s1089_s14, 3 }
   0xa   : > { %s120_s22 = sshll.u32 %s1366_s1, 4  ;;  %s1091_s24 = smov [#allocation4]   ;;  %s121_s22 = int_to_ptr.hbm [resolvable:$true] %s120_s22 }
   0xb   : > { %p1163_p8 = pnand %p827_p5, %p108_p7  ;;  %s122_s25 = sshll.u32 %s1091_s24, 4  ;;  %s123_s25 = int_to_ptr.vmem [resolvable:$true] %s122_s25 }
   0xc   : > { %p889_p10 = scmp.lt.s32.totalorder %s1089_s14, 2  ;;  %s28_s27 = sadd.s32 1, %s1085_s13 }
   0xd   : > { %p880_p9 = pneg %p1163_p8  ;;  %p30_p13 = scmp.ge.s32.totalorder %s28_s27, 2 }
   0xe   : > { %p1174_p12 = pnand %p889_p10, %p1148_p4  ;;  %s133_s28 = sand.u32 1, %s1077_s11  }
   0xf   : > { %p881_p11 = pnand %p880_p9, %p1144_p3  ;;  %s872_s29 = smul.u32 72, %s1085_s13 }
  0x10   : > { %s1391_s27 = smov (%p30_p13, %s28_s27), 0  ;;  %s871_s30 = smul.u32 72, %s133_s28 }
  0x11   : > { %883 = dma.hbm_to_vmem [thread:$0]  (!%p881_p11), %s121_s22, 32, %s123_s25, [#allocation5]  }
  0x12   : > { %s32_s3 = ssub.s32 %s1085_s13, %s1391_s27  ;;  %s144_s6 = scalar_lea.hbm %s1365_s0, %s872_s29 }
  0x13   : > { %p35_p0 = scmp.eq.s32.totalorder %s32_s3, 0  ;;  %s145_s7 = sshll.u32 %s144_s6, 4  ;;  %s146_s7 = int_to_ptr.hbm [resolvable:$true] %s145_s7 }
  0x14   : > { %s137_s8 = scalar_lea.vmem [#allocation2], %s871_s30  ;;  %s134_s18 = scalar_lea.sflag [#allocation3], %s133_s28 }
  0x15   : > { %s147_s9 = sshll.u32 %s137_s8, 4  ;;  %s1092_s20 = smov 128   ;;  %s148_s9 = int_to_ptr.vmem [resolvable:$true] %s147_s9 }
  0x16   : > { %s1191_s15 = scalar_select %p35_p0, %s1077_s11, %s37_s16  }
  0x17   : > { %s1093_s21 = smov 8   ;;  %159 = sbr.rel (%p1163_p8) target bundleno = 348 (0x15c), region = 28 }
  0x18   : > { %887 = dma.hbm_to_vmem [thread:$0]  (!%p1174_p12), %s146_s7, 1152, %s148_s9, %s134_s18, %s1092_s20, %s1092_s20, %s1093_s21  }
  0x19   : > { %s161_s22 = sand.u32 (!%p1163_p8), 1, %s1073_s10  }
  0x1a   : > { %s873_s24 = smul.u32 (!%p1163_p8), 72, %s161_s22  ;;  %s162_s25 = scalar_lea.sflag (!%p1163_p8), [#allocation3], %s161_s22 }
  0x1c   : > { %s165_s29 = scalar_lea.vmem [#allocation2], %s873_s24 }
  0x1d   : > { %1060 = dma.done.wait (%p1155_p6), %s162_s25, 1152  }
  0x1e   : > { %1062 = vsyncadd (%p1155_p6), %s162_s25, 4294966144 }
  0x1f   : > { %1064 = dma.done.wait (%p1144_p3), [#allocation5], 32  }
  0x20   : > { %1066 = vsyncadd (%p1144_p3), [#allocation5], 4294967264  ;;  %vm204_vm0 = vcmask 261120   ;;  %v203_v0 = vld [vmem:[%s165_s29] sm:$0xff]  ;;  %v837_v1 = vld [vmem:[%s165_s29 + $0x8] sm:$0xff]  ;;  %vm251_vm1 = vcmask 58368  }
  0x21   : > { %v841_v2 = vld [vmem:[%s165_s29 + $0x10] sm:$0xff]  ;;  %834 = vmatpush.xpose.msk.msra.mxu0 %vm204_vm0, %v203_v0  ;;  %838 = vmatpush.xpose.msk.msra.mxu1 %vm204_vm0, %v837_v1  ;;  %v845_v3 = vld [vmem:[%s165_s29 + $0x18] sm:$0xff]  ;;  %v853_v5 = vld [vmem:[%s165_s29 + $0x28] sm:$0xff]  ;;  %p192_p1 = scmp.lt.s32.totalorder %s1081_s12, 1 }
  0x22   : > { %v202_v4 = vld [vmem:[#allocation4] sm:$0x3]  ;;  %842 = vmatpush.xpose.msk.msra.mxu2 %vm204_vm0, %v841_v2  ;;  %846 = vmatpush.xpose.msk.msra.mxu3 %vm204_vm0, %v845_v3  ;;  %v849_v7 = vld [vmem:[%s165_s29 + $0x20] sm:$0xff]  ;;  %v861_v8 = vld [vmem:[%s165_s29 + $0x38] sm:$0xff] }
  0x23   : > { %v857_v6 = vld [vmem:[%s165_s29 + $0x30] sm:$0xff]  ;;  %v865_v9 = vld [vmem:[%s165_s29 + $0x40] sm:$0xff]  ;;  %s1393_s12 = smov (!%p192_p1, %s1081_s12), 1 }
  0x24   : > { %835 = vmatmul.msk.f32.vlgmr.msra.gmra.mxu0 %vm204_vm0, %v202_v4  ;;  %839 = vmatmul.msk.f32.vlgmr.msra.gmra.mxu1 %vm204_vm0, %v202_v4  ;;  %s833_s16 = sshll.u32 %s1393_s12, 1 }
  0x25   : > { %854 = vmatpush.xpose.msk.msrb.mxu1 %vm204_vm0, %v853_v5  ;;  %843 = vmatmul.msk.f32.vlgmr.msra.gmra.mxu2 %vm204_vm0, %v202_v4  ;;  %s195_s23 = scalar_lea.vmem %s1367_s2, %s833_s16 }
  0x26   : > { %858 = vmatpush.xpose.msk.msrb.mxu2 %vm204_vm0, %v857_v6  ;;  %847 = vmatmul.msk.f32.vlgmr.msra.gmra.mxu3 %vm204_vm0, %v202_v4 }
  0x27   : > { %850 = vmatpush.xpose.msk.msrb.mxu0 %vm204_vm0, %v849_v7  ;;  %862 = vmatpush.xpose.msk.msrb.mxu3 %vm204_vm0, %v861_v8 }
  0x2b   : > { %866 = vmatpush.xpose.msk.msra.mxu0 %vm204_vm0, %v865_v9 }
  0x2c   : > { %851 = vmatmul.msk.f32.vlgmr.msrb.gmra.mxu0 %vm204_vm0, %v202_v4  ;;  %855 = vmatmul.msk.f32.vlgmr.msrb.gmra.mxu1 %vm204_vm0, %v202_v4 }
  0x2d   : > { %859 = vmatmul.msk.f32.vlgmr.msrb.gmra.mxu2 %vm204_vm0, %v202_v4 }
  0x2e   : > { %863 = vmatmul.msk.f32.vlgmr.msrb.gmra.mxu3 %vm204_vm0, %v202_v4 }
  0x34   : > { %867 = vmatmul.msk.f32.vlgmr.msra.gmra.mxu0 %vm204_vm0, %v202_v4 }
  0xa1   : > { %v228_v10 = vpop.f32.mrf.mxu0  ;;  %v287_v11 = vpop.f32.mrf.mxu1 }
  0xa2   : > { %v840_v12 = vmul.f32 -2.0, %v287_v11 }
  0xa4   : > { %v292_v13 = vmul.f32 1.442695, %v840_v12 }
  0xa6   : > { %943 = vpow2.f32 %v292_v13 }
  0xa8   : > { %v345_v14 = vpop.f32.mrf.mxu2 }
  0xa9   : > { %v403_v15 = vpop.f32.mrf.mxu3  ;;  %v844_v16 = vmul.f32 -2.0, %v345_v14  ;;  %v461_v18 = vpop.f32.mrf.mxu0 }
  0xaa   : > { %v848_v17 = vmul.f32 -2.0, %v403_v15  ;;  %v519_v19 = vpop.f32.mrf.mxu1  ;;  %v852_v20 = vmul.f32 -2.0, %v461_v18 }
  0xab   : > { %v856_v21 = vmul.f32 -2.0, %v519_v19  ;;  %v350_v22 = vmul.f32 1.442695, %v844_v16 }
  0xac   : > { %v408_v23 = vmul.f32 1.442695, %v848_v17  ;;  %v944_v24 = vpop.eup %943  ;;  %v466_v25 = vmul.f32 1.442695, %v852_v20 }
  0xad   : > { %v294_v26 = vadd.f32 1.0, %v944_v24  ;;  %945 = vpow2.f32 %v350_v22  ;;  %v524_v27 = vmul.f32 1.442695, %v856_v21 }
  0xae   : > { %947 = vpow2.f32 %v408_v23 }
  0xaf   : > { %949 = vrcp.f32 %v294_v26  ;;  %v304_v43 = vand.u32 2147483647, %v294_v26  ;;  %v306_v47 = vand.u32 2147483648, %v294_v26  ;;  %vm300_vm2 = vweird.f32 %v294_v26 }
  0xb0   : > { %951 = vpow2.f32 %v466_v25  ;;  %v577_v28 = vpop.f32.mrf.mxu2 }
  0xb1   : > { %v635_v29 = vpop.f32.mrf.mxu3  ;;  %953 = vpow2.f32 %v524_v27  ;;  %v860_v30 = vmul.f32 -2.0, %v577_v28  ;;  %v693_v32 = vpop.f32.mrf.mxu0  ;;  %vm1239_vm4 = vcmp.eq.f32.partialorder %v304_v43, 8.507059e+37  ;;  %v307_v56 = vor.u32 1.1754944e-38, %v306_v47 }
  0xb2   : > { %v864_v31 = vmul.f32 -2.0, %v635_v29  ;;  %v868_v35 = vmul.f32 -2.0, %v693_v32 }
  0xb3   : > { %v946_v33 = vpop.eup %945  ;;  %v582_v34 = vmul.f32 1.442695, %v860_v30 }
  0xb4   : > { %v948_v36 = vpop.eup %947  ;;  %v1224_v37 = vadd.f32 1.0, %v946_v33  ;;  %v640_v38 = vmul.f32 1.442695, %v864_v31  ;;  %v698_v46 = vmul.f32 1.442695, %v868_v35 }
  0xb5   : > { %v950_v39 = vpop.eup %949  ;;  %v1226_v40 = vadd.f32 1.0, %v948_v36  ;;  %955 = vpow2.f32 %v582_v34 }
  0xb6   : > { %v952_v41 = vpop.eup %951  ;;  %957 = vrcp.f32 %v1224_v37  ;;  %v296_v42 = vmul.f32 %v950_v39, %v294_v26  ;;  %vm301_vm3 = vweird.f32 %v950_v39  ;;  %v362_v53 = vand.u32 2147483647, %v1224_v37 }
  0xb7   : > { %v954_v44 = vpop.eup %953  ;;  %959 = vrcp.f32 %v1226_v40  ;;  %v1230_v45 = vadd.f32 1.0, %v952_v41  ;;  %v422_v50 = vand.u32 2147483648, %v1226_v40  ;;  %v420_v52 = vand.u32 2147483647, %v1226_v40  ;;  %vm302_vm7 = vmor %vm300_vm2, %vm301_vm3 }
  0xb8   : > { %v1232_v48 = vadd.f32 1.0, %v954_v44  ;;  %961 = vpow2.f32 %v640_v38  ;;  %v297_v49 = vsub.f32 1.0, %v296_v42  ;;  %v364_v57 = vand.u32 2147483648, %v1224_v37 }
  0xb9   : > { %963 = vrcp.f32 %v1230_v45  ;;  %vm416_vm5 = vweird.f32 %v1226_v40  ;;  %vm358_vm6 = vweird.f32 %v1224_v37  ;;  %v423_v62 = vor.u32 1.1754944e-38, %v422_v50 }
  0xba   : > { %965 = vrcp.f32 %v1232_v48  ;;  %v298_v51 = vmul.f32 %v950_v39, %v297_v49  ;;  %v536_v63 = vand.u32 2147483647, %v1232_v48  ;;  %v538_v0 = vand.u32 2147483648, %v1232_v48 }
  0xbb   : > { %v956_v54 = vpop.eup %955  ;;  %967 = vpow2.f32 %v698_v46  ;;  %vm1255_vm8 = vcmp.eq.f32.partialorder %v420_v52, 8.507059e+37  ;;  %vm1259_vm9 = vcmp.eq.f32.partialorder %v362_v53, 8.507059e+37  ;;  %vm532_vm10 = vweird.f32 %v1232_v48 }
  0xbc   : > { %v958_v58 = vpop.eup %957  ;;  %v1244_v59 = vadd.f32 1.0, %v956_v54  ;;  %v299_v60 = vadd.f32 %v950_v39, %v298_v51  ;;  %v365_v11 = vor.u32 1.1754944e-38, %v364_v57  ;;  %vm474_vm11 = vweird.f32 %v1230_v45 }
  0xbd   : > { %v960_v61 = vpop.eup %959  ;;  %v354_v1 = vmul.f32 %v958_v58, %v1224_v37  ;;  %vm359_vm12 = vweird.f32 %v958_v58  ;;  %vm1278_vm14 = vcmp.eq.f32.partialorder %v536_v63, 8.507059e+37  ;;  %v539_v24 = vor.u32 1.1754944e-38, %v538_v0 }
  0xbe   : > { %v962_v2 = vpop.eup %961  ;;  %969 = vrcp.f32 %v1244_v59  ;;  %v303_v3 = vsel %vm302_vm7, %v950_v39, %v299_v60  ;;  %v412_v4 = vmul.f32 %v960_v61, %v1226_v40  ;;  %vm417_vm13 = vweird.f32 %v960_v61  ;;  %vm360_vm15 = vmor %vm358_vm6, %vm359_vm12 }
  0xbf   : > { %v1263_v7 = vpop.eup %963  ;;  %v1265_v8 = vadd.f32 1.0, %v962_v2  ;;  %v308_v9 = vsel %vm1239_vm4, %v307_v56, %v303_v3  ;;  %v355_v10 = vsub.f32 1.0, %v354_v1  ;;  %vm418_vm2 = vmor %vm416_vm5, %vm417_vm13  ;;  %v480_v35 = vand.u32 2147483648, %v1230_v45 }
  0xc0   : > { %v966_v12 = vpop.eup %965  ;;  %v310_v13 = vsel %vm251_vm1, %v308_v9, 0.0  ;;  %v413_v14 = vsub.f32 1.0, %v412_v4  ;;  %v470_v15 = vmul.f32 %v1263_v7, %v1230_v45  ;;  %vm475_vm0 = vweird.f32 %v1263_v7 }
  0xc1   : > { %v968_v16 = vpop.eup %967  ;;  %971 = vrcp.f32 %v1265_v8  ;;  %311 = vadd.xlane.f32.xlu0 %v310_v13  ;;  %v528_v17 = vmul.f32 %v966_v12, %v1232_v48  ;;  %v356_v18 = vmul.f32 %v958_v58, %v355_v10  ;;  %vm533_vm3 = vweird.f32 %v966_v12  ;;  %vm1298_vm4 = vmor %vm474_vm11, %vm475_vm0 }
  0xc2   : > { %v1276_v19 = vadd.f32 1.0, %v968_v16  ;;  %v414_v20 = vmul.f32 %v960_v61, %v413_v14  ;;  %v471_v21 = vsub.f32 1.0, %v470_v15  ;;  %v478_v40 = vand.u32 2147483647, %v1230_v45  ;;  %vm534_vm5 = vmor %vm532_vm10, %vm533_vm3 }
  0xc3   : > { %v529_v22 = vsub.f32 1.0, %v528_v17  ;;  %v357_v25 = vadd.f32 %v958_v58, %v356_v18  ;;  %v594_v44 = vand.u32 2147483647, %v1244_v59  ;;  %v596_v45 = vand.u32 2147483648, %v1244_v59 }
  0xc4   : > { %v970_v26 = vpop.eup %969  ;;  %973 = vrcp.f32 %v1276_v19  ;;  %v415_v27 = vadd.f32 %v960_v61, %v414_v20  ;;  %v472_v28 = vmul.f32 %v1263_v7, %v471_v21  ;;  %v481_v51 = vor.u32 1.1754944e-38, %v480_v35 }
  0xc5   : > { %v530_v29 = vmul.f32 %v966_v12, %v529_v22  ;;  %v361_v30 = vsel %vm360_vm15, %v958_v58, %v357_v25  ;;  %v586_v31 = vmul.f32 %v970_v26, %v1244_v59  ;;  %vm591_vm6 = vweird.f32 %v970_v26 }
  0xc6   : > { %v419_v32 = vsel %vm418_vm2, %v960_v61, %v415_v27  ;;  %v366_v33 = vsel %vm1259_vm9, %v365_v11, %v361_v30  ;;  %v473_v34 = vadd.f32 %v1263_v7, %v472_v28  ;;  %vm479_vm7 = vcmp.eq.f32.partialorder %v478_v40, 8.507059e+37 }
  0xc7   : > { %v972_v36 = vpop.eup %971  ;;  %v424_v37 = vsel %vm1255_vm8, %v423_v62, %v419_v32  ;;  %v531_v38 = vadd.f32 %v966_v12, %v530_v29  ;;  %v587_v41 = vsub.f32 1.0, %v586_v31  ;;  %v368_v43 = vsel %vm251_vm1, %v366_v33, 0.0 }
  0xc8   : > { %v426_v42 = vsel %vm251_vm1, %v424_v37, 0.0  ;;  %v477_v47 = vsel %vm1298_vm4, %v1263_v7, %v473_v34  ;;  %v644_v52 = vmul.f32 %v972_v36, %v1265_v8  ;;  %vm590_vm8 = vweird.f32 %v1244_v59 }
  0xc9   : > { %427 = vadd.xlane.f32.xlu1 %v426_v42  ;;  %v535_v46 = vsel %vm534_vm5, %v966_v12, %v531_v38  ;;  %369 = vadd.xlane.f32.xlu0 %v368_v43  ;;  %v588_v49 = vmul.f32 %v970_v26, %v587_v41  ;;  %v482_v55 = vsel %vm479_vm7, %v481_v51, %v477_v47  ;;  %vm1318_vm9 = vmor %vm590_vm8, %vm591_vm6  ;;  %vm595_vm10 = vcmp.eq.f32.partialorder %v594_v44, 8.507059e+37 }
  0xca   : > { %v974_v50 = vpop.eup %973  ;;  %v540_v48 = vsel %vm1278_vm14, %v539_v24, %v535_v46  ;;  %v645_v57 = vsub.f32 1.0, %v644_v52  ;;  %v597_v61 = vor.u32 1.1754944e-38, %v596_v45  ;;  %vm648_vm11 = vweird.f32 %v1265_v8 }
  0xcb   : > { %v542_v53 = vsel %vm251_vm1, %v540_v48, 0.0  ;;  %v589_v54 = vadd.f32 %v970_v26, %v588_v49  ;;  %v702_v58 = vmul.f32 %v974_v50, %v1276_v19  ;;  %v654_v62 = vand.u32 2147483648, %v1265_v8 }
  0xcc   : > { %543 = vadd.xlane.f32.xlu2 %v542_v53  ;;  %v646_v59 = vmul.f32 %v972_v36, %v645_v57  ;;  %vm649_vm12 = vweird.f32 %v972_v36  ;;  %v652_v63 = vand.u32 2147483647, %v1265_v8  ;;  %v484_v1 = vsel %vm251_vm1, %v482_v55, 0.0 }
  0xcd   : > { %v593_v60 = vsel %vm1318_vm9, %v970_v26, %v589_v54  ;;  %v703_v0 = vsub.f32 1.0, %v702_v58  ;;  %vm706_vm13 = vweird.f32 %v1276_v19  ;;  %vm707_vm14 = vweird.f32 %v974_v50  ;;  %vm650_vm15 = vmor %vm648_vm11, %vm649_vm12 }
  0xce   : > { %v712_v2 = vand.u32 2147483648, %v1276_v19  ;;  %v598_v3 = vsel %vm595_vm10, %v597_v61, %v593_v60  ;;  %v647_v4 = vadd.f32 %v972_v36, %v646_v59  ;;  %v710_v6 = vand.u32 2147483647, %v1276_v19  ;;  %vm708_vm2 = vmor %vm706_vm13, %vm707_vm14 }
  0xcf   : > { %v704_v5 = vmul.f32 %v974_v50, %v703_v0  ;;  %v655_v7 = vor.u32 1.1754944e-38, %v654_v62  ;;  %vm653_vm0 = vcmp.eq.f32.partialorder %v652_v63, 8.507059e+37  ;;  %v600_v11 = vsel %vm251_vm1, %v598_v3, 0.0 }
  0xd0   : > { %v651_v9 = vsel %vm650_vm15, %v972_v36, %v647_v4  ;;  %v713_v13 = vor.u32 1.1754944e-38, %v712_v2  ;;  %vm711_vm3 = vcmp.eq.f32.partialorder %v710_v6, 8.507059e+37  ;;  %vm200_vm4 = vcmask 1024  }
  0xd1   : > { %485 = vadd.xlane.f32.xlu1 %v484_v1  ;;  %v705_v10 = vadd.f32 %v974_v50, %v704_v5  ;;  %v656_v12 = vsel %vm653_vm0, %v655_v7, %v651_v9  ;;  %v1094_v17 = vmov 0.0  }
  0xd2   : > { %v658_v14 = vsel %vm251_vm1, %v656_v12, 0.0  ;;  %201 = vst.msk [vmem:[%s195_s23] sm:$0x3] %vm200_vm4, %v1094_v17 }
  0xd3   : > { %v709_v15 = vsel %vm708_vm2, %v974_v50, %v705_v10  ;;  %659 = vadd.xlane.f32.xlu0 %v658_v14 }
  0xd4   : > { %601 = vadd.xlane.f32.xlu2 %v600_v11  ;;  %v714_v8 = vsel %vm711_vm3, %v713_v13, %v709_v15 }
  0xd5   : > { %v716_v16 = vsel %vm251_vm1, %v714_v8, 0.0 }
  0xd9   : > { %717 = vadd.xlane.f32.xlu1 %v716_v16  ;;  %v729_v32 = vld [vmem:[%s195_s23] sm:$0x3] }
 0x134   : > { %v312_v18 = vpop.xlane.xlu0 %311 }
 0x13c   : > { %v428_v19 = vpop.xlane.xlu1 %427  ;;  %v370_v20 = vpop.xlane.xlu0 %369 }
 0x13d   : > { %v380_v22 = vadd.f32 %v370_v20, %v312_v18 }
 0x13f   : > { %v544_v21 = vpop.xlane.xlu2 %543  ;;  %v438_v23 = vadd.f32 %v428_v19, %v380_v22 }
 0x144   : > { %v486_v24 = vpop.xlane.xlu1 %485 }
 0x145   : > { %v496_v25 = vadd.f32 %v486_v24, %v438_v23 }
 0x146   : > { %v660_v29 = vpop.xlane.xlu0 %659 }
 0x147   : > { %v554_v26 = vadd.f32 %v544_v21, %v496_v25  ;;  %v602_v27 = vpop.xlane.xlu2 %601 }
 0x149   : > { %v612_v28 = vadd.f32 %v602_v27, %v554_v26 }
 0x14b   : > { %v670_v30 = vadd.f32 %v660_v29, %v612_v28 }
 0x14c   : > { %v718_v31 = vpop.xlane.xlu1 %717 }
 0x14d   : > { %v728_v33 = vadd.f32 %v718_v31, %v670_v30 }
 0x14f   : > { %v730_v34 = vadd.f32 %v729_v32, %v728_v33 }
 0x151   : > { %732 = vst.msk [vmem:[%s195_s23] sm:$0x3] %vm200_vm4, %v730_v34 }
 0x158   : > { %v736_v35 = vld [vmem:[%s195_s23] sm:$0x3] }
 0x159   : > { %v737_v36 = vmul.f32 0.015625, %v736_v35 }
 0x15b   : > { %738 = vst.msk [vmem:[%s195_s23] sm:$0x3] %vm200_vm4, %v737_v36 }
 0x15c PF: > { %s16_s14 = sadd.s32 1, %s1089_s14   ;;  %s1385_s9 = smov %s1073_s10 }
 0x15d   : > { %p13_p2 = scmp.ge.s32.totalorder %s16_s14, 4   ;;  %s1386_s10 = smov %s1077_s11 }
 0x15e   : > { %s1387_s11 = smov %s1191_s15  ;;  %s1388_s12 = smov %s1085_s13 }
 0x15f   : > { %s1389_s13 = smov %s1391_s27  ;;  %15 = sbr.rel (!%p13_p2) target bundleno = 5 (0x5), region = 88 }
 0x164   :  { %758 = vsyncpa [#allocation3], 1 }
 0x165   :  { %760 = vsyncpa [#allocation3 + $0x1], 1 }
 0x166   :  { %761 = vsyncpa [#allocation5], 1 }

</bundles_post_ra>
